<compile_context>
chip_gen: v6e
topology: v6e:2x2x1
jax: 0.10.0
libtpu: 0.0.40
codegen_flags: <defaults>
</compile_context>

<pallas_src>
import functools

import jax
import jax.numpy as jnp
from jax.experimental import pallas as pl
from jax.experimental.pallas import tpu as pltpu


# ----------------------------------------------------------------------------
# Kernels
# ----------------------------------------------------------------------------
def actnorm_stats_kernel(x_ref, scale_ref, bias_ref,
                         shift_sc, sum_sc, sq_sc, *, n_total):
    """Per-channel mean / unbiased std across the whole (B, HW) extent.

    x_ref    : (C, tile_hw) slab (native dtype) of the (B, C, HW) input
    scale_ref: (C, 1) f32 output -> 1 / (std + 1e-9)   (ddof=1, like torch)
    bias_ref : (C, 1) f32 output -> -mean
    """
    b = pl.program_id(0)
    j = pl.program_id(1)
    is_first = jnp.logical_and(b == 0, j == 0)
    is_last = jnp.logical_and(b == pl.num_programs(0) - 1,
                              j == pl.num_programs(1) - 1)

    x = x_ref[...].astype(jnp.float32)                       # (C, tile_hw)

    @pl.when(is_first)
    def _():
        # Per-channel shift from the first tile: turns the single-pass
        # E[x^2] - mean^2 form into a well-conditioned shifted accumulation.
        shift_sc[...] = jnp.mean(x, axis=1, keepdims=True)
        sum_sc[...] = jnp.zeros_like(sum_sc)
        sq_sc[...] = jnp.zeros_like(sq_sc)

    xs = x - shift_sc[...]
    sum_sc[...] += jnp.sum(xs, axis=1, keepdims=True)
    sq_sc[...] += jnp.sum(xs * xs, axis=1, keepdims=True)

    @pl.when(is_last)
    def _():
        n = jnp.float32(n_total)
        s = sum_sc[...]
        mean = shift_sc[...] + s / n
        var = (sq_sc[...] - s * s / n) / (n - 1.0)           # unbiased (ddof=1)
        std = jnp.sqrt(jnp.maximum(var, 0.0))
        scale_ref[...] = 1.0 / (std + 1e-9)
        bias_ref[...] = -mean


def actnorm_apply_kernel(scale_ref, bias_ref, x_ref, y_ref):
    """y = (x + bias) * scale, streamed in native dtype, f32 in-register."""
    x = x_ref[...].astype(jnp.float32)                       # (C, tile_hw)
    y_ref[...] = ((x + bias_ref[...]) * scale_ref[...]).astype(y_ref.dtype)


# ----------------------------------------------------------------------------
# Tiling helpers
# ----------------------------------------------------------------------------
def _pick_tile_hw(hw, c, itemsize, target_bytes=4 << 20):
    """Largest lane tile (multiple of 128) dividing hw with a (C, tile) block
    of roughly target_bytes.  Full-extent fallback when hw is ragged."""
    if hw % 128 != 0:
        # TODO(synk): for large ragged HW, pad to a 128 multiple instead of
        # taking a (legal but possibly oversized) full-extent block.
        return hw
    target = max(128, ((target_bytes // max(1, itemsize * c)) // 128) * 128)
    t = min(target, hw)
    while hw % t != 0:
        t -= 128
    return t


def _vmem_limit(n_pipelined_tiles, tile_bytes):
    # double-buffered pipelined tiles + a little slack; keep within the 64 MiB
    # physical VMEM of v7x while raising v5e's 16 MiB scoped default.
    needed = 2 * n_pipelined_tiles * tile_bytes + (2 << 20)
    return int(min(max(needed, 16 << 20), 48 << 20))


# ----------------------------------------------------------------------------
# Pallas call wrappers
# ----------------------------------------------------------------------------
def _compute_stats(x_3d):
    B, C, HW = x_3d.shape
    itemsize = x_3d.dtype.itemsize
    tile_hw = _pick_tile_hw(HW, C, itemsize)
    n_total = B * HW
    tile_bytes = C * tile_hw * itemsize
    kernel = functools.partial(actnorm_stats_kernel, n_total=n_total)
    scale, bias = pl.pallas_call(
        kernel,
        out_shape=(jax.ShapeDtypeStruct((C, 1), jnp.float32),
                   jax.ShapeDtypeStruct((C, 1), jnp.float32)),
        grid_spec=pltpu.PrefetchScalarGridSpec(
            num_scalar_prefetch=0,
            grid=(B, HW // tile_hw),
            in_specs=[pl.BlockSpec((None, C, tile_hw),
                                   lambda b, j: (b, 0, j))],
            out_specs=(pl.BlockSpec((C, 1), lambda b, j: (0, 0)),
                       pl.BlockSpec((C, 1), lambda b, j: (0, 0))),
            scratch_shapes=[pltpu.VMEM((C, 1), jnp.float32),
                            pltpu.VMEM((C, 1), jnp.float32),
                            pltpu.VMEM((C, 1), jnp.float32)]),
        compiler_params=pltpu.CompilerParams(
            dimension_semantics=("arbitrary", "arbitrary"),   # carried accum
            vmem_limit_bytes=_vmem_limit(1, tile_bytes)),
        cost_estimate=pl.CostEstimate(
            flops=3 * C * n_total,
            transcendentals=0,
            bytes_accessed=C * n_total * itemsize + 2 * C * 4),
    )(x_3d)
    return scale, bias


def _apply(x_3d, scale_c1, bias_c1):
    B, C, HW = x_3d.shape
    itemsize = x_3d.dtype.itemsize
    tile_hw = _pick_tile_hw(HW, C, itemsize)
    n_total = B * HW
    tile_bytes = C * tile_hw * itemsize
    y = pl.pallas_call(
        actnorm_apply_kernel,
        out_shape=jax.ShapeDtypeStruct((B, C, HW), x_3d.dtype),
        grid_spec=pltpu.PrefetchScalarGridSpec(
            num_scalar_prefetch=0,
            grid=(B, HW // tile_hw),
            in_specs=[pl.BlockSpec((C, 1), lambda b, j: (0, 0)),
                      pl.BlockSpec((C, 1), lambda b, j: (0, 0)),
                      pl.BlockSpec((None, C, tile_hw),
                                   lambda b, j: (b, 0, j))],
            out_specs=pl.BlockSpec((None, C, tile_hw),
                                   lambda b, j: (b, 0, j)),
        ),
        compiler_params=pltpu.CompilerParams(
            dimension_semantics=("parallel", "parallel"),     # 2 TCs on v7x
            vmem_limit_bytes=_vmem_limit(2, tile_bytes)),
        cost_estimate=pl.CostEstimate(
            flops=2 * C * n_total,
            transcendentals=0,
            bytes_accessed=2 * C * n_total * itemsize),
    )(scale_c1, bias_c1, x_3d)
    return y


# ----------------------------------------------------------------------------
# Forward
# ----------------------------------------------------------------------------
@functools.partial(jax.jit, static_argnames=("initialized",))
def actnorm_forward(x, scale, bias, initialized=False):
    """x: (B, C, H, W); scale/bias: (1, C, 1, 1).

    Returns (y, log_det, scale_out, bias_out).  When initialized=False the
    returned scale/bias are the data-dependent statistics (functional version
    of the PyTorch in-place parameter update); otherwise they pass through.
    """
    B, C, H, W = x.shape
    HW = H * W
    x_3d = x.reshape(B, C, HW)                 # free reshape, native layout/dtype

    if not initialized:
        # TODO(synk): PyTorch mutates module state (`self.scale.data`,
        # `self.initialize`); here state is functional — new params returned.
        scale_c1, bias_c1 = _compute_stats(x_3d)
    else:
        scale_c1 = scale.reshape(C, 1).astype(jnp.float32)
        bias_c1 = bias.reshape(C, 1).astype(jnp.float32)

    y = _apply(x_3d, scale_c1, bias_c1).reshape(B, C, H, W)

    # log_det hoisted out of the kernel: O(C) work, computed once.
    log_det = jnp.broadcast_to(
        HW * jnp.sum(jnp.log(jnp.abs(scale_c1))), (B,))
    return y, log_det, scale_c1.reshape(1, C, 1, 1), bias_c1.reshape(1, C, 1, 1)


# ----------------------------------------------------------------------------
# Pure-JAX reference (mirrors the PyTorch forward) + test
# ----------------------------------------------------------------------------
def reference_forward(x, scale, bias, initialized=False):
    b, c, h, w = x.shape
    if not initialized:
        data = jnp.transpose(x, (1, 0, 2, 3)).reshape(c, -1)
        mean = jnp.mean(data, axis=-1)
        std = jnp.std(data, axis=-1, ddof=1)
        scale = (1.0 / (std + 1e-9)).reshape(1, c, 1, 1)
        bias = (-mean).reshape(1, c, 1, 1)
    y = (x + bias) * scale
    log_det = h * w * jnp.sum(jnp.log(jnp.abs(scale)))
    return y, jnp.full((b,), log_det), scale, bias


if __name__ == "__main__":
    B, C, H, W = 2, 4, 16, 16
    key = jax.random.PRNGKey(0)
    kx, ks, kb = jax.random.split(key, 3)
    x = jax.random.normal(kx, (B, C, H, W), jnp.float32) * 1.5 + 0.3

    # --- uninitialized path: data-dependent init of scale / bias ------------
    dummy_scale = jnp.zeros((1, C, 1, 1), jnp.float32)  # unused when init=False
    dummy_bias = jnp.zeros((1, C, 1, 1), jnp.float32)
    y0, ld0, s0, b0 = actnorm_forward(x, dummy_scale, dummy_bias,
                                      initialized=False)
    jax.block_until_ready((y0, ld0, s0, b0))
    y0r, ld0r, s0r, b0r = reference_forward(x, dummy_scale, dummy_bias, False)

    assert jnp.allclose(s0, s0r, atol=1e-3, rtol=1e-3), "scale mismatch"
    assert jnp.allclose(b0, b0r, atol=1e-3, rtol=1e-3), "bias mismatch"
    assert jnp.allclose(y0, y0r, atol=1e-3, rtol=1e-3), "y (init path) mismatch"
    assert jnp.allclose(ld0, ld0r, atol=1e-2, rtol=1e-3), "log_det (init) mismatch"

    # --- initialized path: reuse given scale/bias (subsequent forward calls) -
    scale = 0.5 + jax.random.uniform(ks, (1, C, 1, 1), jnp.float32)
    bias = jax.random.normal(kb, (1, C, 1, 1), jnp.float32)
    y1, ld1, _, _ = actnorm_forward(x, scale, bias, initialized=True)
    jax.block_until_ready((y1, ld1))
    y1r, ld1r, _, _ = reference_forward(x, scale, bias, True)

    assert jnp.allclose(y1, y1r, atol=1e-5, rtol=1e-5), "y (apply path) mismatch"
    assert jnp.allclose(ld1, ld1r, atol=1e-4, rtol=1e-5), "log_det (apply) mismatch"

    print("KERNEL_OK")
</pallas_src>

<mosaic_0001>
module attributes {stable_mosaic.version = 11 : i64} {
  func.func @actnorm_apply_kernel(%arg0: i32, %arg1: i32, %arg2: memref<4x1xf32, #tpu.memory_space<vmem>>, %arg3: memref<4x1xf32, #tpu.memory_space<vmem>>, %arg4: memref<1x4x256xf32, #tpu.memory_space<vmem>>, %arg5: memref<1x4x256xf32, #tpu.memory_space<vmem>>) attributes {dimension_semantics = [#tpu.dimension_semantics<parallel>, #tpu.dimension_semantics<parallel>], iteration_bounds = array<i64: 2, 1>, scalar_prefetch = 0 : i64, scratch_operands = 0 : i64, tpu.core_type = #tpu.core_type<tc>, window_params = [{pipeline_mode = #tpu.pipeline_mode<synchronous>, transform_indices = @transform_0, window_bounds = array<i64: 4, 1>}, {pipeline_mode = #tpu.pipeline_mode<synchronous>, transform_indices = @transform_1, window_bounds = array<i64: 4, 1>}, {transform_indices = @transform_2, window_bounds = array<i64: 1, 4, 256>}, {transform_indices = @transform_3, window_bounds = array<i64: 1, 4, 256>}]} {
    %c0 = arith.constant 0 : index
    %c0_0 = arith.constant 0 : index
    %c0_1 = arith.constant 0 : index
    %0 = vector.load %arg4[%c0, %c0_0, %c0_1] : memref<1x4x256xf32, #tpu.memory_space<vmem>>, vector<1x4x256xf32>
    %1 = vector.shape_cast %0 : vector<1x4x256xf32> to vector<4x256xf32>
    %c0_2 = arith.constant 0 : index
    %c0_3 = arith.constant 0 : index
    %2 = vector.load %arg3[%c0_2, %c0_3] : memref<4x1xf32, #tpu.memory_space<vmem>>, vector<4x1xf32>
    %3 = vector.broadcast %2 : vector<4x1xf32> to vector<4x256xf32>
    %4 = arith.addf %1, %3 : vector<4x256xf32>
    %c0_4 = arith.constant 0 : index
    %c0_5 = arith.constant 0 : index
    %5 = vector.load %arg2[%c0_4, %c0_5] : memref<4x1xf32, #tpu.memory_space<vmem>>, vector<4x1xf32>
    %6 = vector.broadcast %5 : vector<4x1xf32> to vector<4x256xf32>
    %7 = arith.mulf %4, %6 : vector<4x256xf32>
    %c0_6 = arith.constant 0 : index
    %c0_7 = arith.constant 0 : index
    %c0_8 = arith.constant 0 : index
    %8 = vector.load %arg5[%c0_6, %c0_7, %c0_8] : memref<1x4x256xf32, #tpu.memory_space<vmem>>, vector<1x4x256xf32>
    %9 = vector.shape_cast %8 : vector<1x4x256xf32> to vector<4x256xf32>
    %10 = vector.shape_cast %7 : vector<4x256xf32> to vector<1x4x256xf32>
    tpu.vector_store %arg5[%c0_6, %c0_7, %c0_8], %10 {strides = array<i32>} : memref<1x4x256xf32, #tpu.memory_space<vmem>>, vector<1x4x256xf32>,
    return
  }
  func.func @transform_0(%arg0: i32, %arg1: i32) -> (i32, i32) {
    %c0_i32 = arith.constant 0 : i32
    %c0_i32_0 = arith.constant 0 : i32
    %c0_i32_1 = arith.constant 0 : i32
    return %c0_i32, %c0_i32_0 : i32, i32
  }
  func.func @transform_1(%arg0: i32, %arg1: i32) -> (i32, i32) {
    %c0_i32 = arith.constant 0 : i32
    %c0_i32_0 = arith.constant 0 : i32
    %c0_i32_1 = arith.constant 0 : i32
    return %c0_i32, %c0_i32_0 : i32, i32
  }
  func.func @transform_2(%arg0: i32, %arg1: i32) -> (i32, i32, i32) {
    %c0_i32 = arith.constant 0 : i32
    %c0_i32_0 = arith.constant 0 : i32
    return %arg0, %c0_i32, %arg1 : i32, i32, i32
  }
  func.func @transform_3(%arg0: i32, %arg1: i32) -> (i32, i32, i32) {
    %c0_i32 = arith.constant 0 : i32
    %c0_i32_0 = arith.constant 0 : i32
    return %arg0, %c0_i32, %arg1 : i32, i32, i32
  }
}

module attributes {stable_mosaic.version = 11 : i64} {
  func.func @actnorm_stats_kernel(%arg0: i32, %arg1: i32, %arg2: memref<1x4x256xf32, #tpu.memory_space<vmem>>, %arg3: memref<4x1xf32, #tpu.memory_space<vmem>>, %arg4: memref<4x1xf32, #tpu.memory_space<vmem>>, %arg5: memref<4x1xf32, #tpu.memory_space<vmem>>, %arg6: memref<4x1xf32, #tpu.memory_space<vmem>>, %arg7: memref<4x1xf32, #tpu.memory_space<vmem>>) attributes {dimension_semantics = [#tpu.dimension_semantics<arbitrary>, #tpu.dimension_semantics<arbitrary>], iteration_bounds = array<i64: 2, 1>, scalar_prefetch = 0 : i64, scratch_operands = 3 : i64, tpu.core_type = #tpu.core_type<tc>, window_params = [{transform_indices = @transform_0, window_bounds = array<i64: 1, 4, 256>}, {pipeline_mode = #tpu.pipeline_mode<synchronous>, transform_indices = @transform_1, window_bounds = array<i64: 4, 1>}, {pipeline_mode = #tpu.pipeline_mode<synchronous>, transform_indices = @transform_2, window_bounds = array<i64: 4, 1>}]} {
    %c0_i32 = arith.constant 0 : i32
    %0 = arith.cmpi eq, %arg0, %c0_i32 : i32
    %c0_i32_0 = arith.constant 0 : i32
    %1 = arith.cmpi eq, %arg1, %c0_i32_0 : i32
    %2 = arith.andi %0, %1 : i1
    %c1_i32 = arith.constant 1 : i32
    %3 = arith.cmpi eq, %arg0, %c1_i32 : i32
    %c0_i32_1 = arith.constant 0 : i32
    %4 = arith.cmpi eq, %arg1, %c0_i32_1 : i32
    %5 = arith.andi %3, %4 : i1
    %c0 = arith.constant 0 : index
    %c0_2 = arith.constant 0 : index
    %c0_3 = arith.constant 0 : index
    %6 = vector.load %arg2[%c0, %c0_2, %c0_3] : memref<1x4x256xf32, #tpu.memory_space<vmem>>, vector<1x4x256xf32>
    %7 = vector.shape_cast %6 : vector<1x4x256xf32> to vector<4x256xf32>
    %8 = arith.extui %2 : i1 to i32
    %c0_i32_4 = arith.constant 0 : i32
    %9 = arith.cmpi ne, %8, %c0_i32_4 : i32
    scf.if %9 {
      %cst_17 = arith.constant dense<0.000000e+00> : vector<4xf32>
      %26 = vector.multi_reduction <add>, %7, %cst_17 [1] : vector<4x256xf32> to vector<4xf32>
      %27 = vector.shape_cast %26 : vector<4xf32> to vector<4x1xf32>
      %cst_18 = arith.constant 2.560000e+02 : f32
      %28 = vector.broadcast %cst_18 : f32 to vector<4x1xf32>
      %29 = arith.divf %27, %28 : vector<4x1xf32>
      %c0_19 = arith.constant 0 : index
      %c0_20 = arith.constant 0 : index
      %30 = vector.load %arg5[%c0_19, %c0_20] : memref<4x1xf32, #tpu.memory_space<vmem>>, vector<4x1xf32>
      tpu.vector_store %arg5[%c0_19, %c0_20], %29 {strides = array<i32>} : memref<4x1xf32, #tpu.memory_space<vmem>>, vector<4x1xf32>,
      %cst_21 = arith.constant 0.000000e+00 : f32
      %31 = vector.broadcast %cst_21 : f32 to vector<4x1xf32>
      %c0_22 = arith.constant 0 : index
      %c0_23 = arith.constant 0 : index
      %32 = vector.load %arg6[%c0_22, %c0_23] : memref<4x1xf32, #tpu.memory_space<vmem>>, vector<4x1xf32>
      tpu.vector_store %arg6[%c0_22, %c0_23], %31 {strides = array<i32>} : memref<4x1xf32, #tpu.memory_space<vmem>>, vector<4x1xf32>,
      %cst_24 = arith.constant 0.000000e+00 : f32
      %33 = vector.broadcast %cst_24 : f32 to vector<4x1xf32>
      %c0_25 = arith.constant 0 : index
      %c0_26 = arith.constant 0 : index
      %34 = vector.load %arg7[%c0_25, %c0_26] : memref<4x1xf32, #tpu.memory_space<vmem>>, vector<4x1xf32>
      tpu.vector_store %arg7[%c0_25, %c0_26], %33 {strides = array<i32>} : memref<4x1xf32, #tpu.memory_space<vmem>>, vector<4x1xf32>,
    } else {
    }
    %c0_5 = arith.constant 0 : index
    %c0_6 = arith.constant 0 : index
    %10 = vector.load %arg5[%c0_5, %c0_6] : memref<4x1xf32, #tpu.memory_space<vmem>>, vector<4x1xf32>
    %11 = vector.broadcast %10 : vector<4x1xf32> to vector<4x256xf32>
    %12 = arith.subf %7, %11 : vector<4x256xf32>
    %c0_7 = arith.constant 0 : index
    %c0_8 = arith.constant 0 : index
    %13 = vector.load %arg6[%c0_7, %c0_8] : memref<4x1xf32, #tpu.memory_space<vmem>>, vector<4x1xf32>
    %cst = arith.constant dense<0.000000e+00> : vector<4xf32>
    %14 = vector.multi_reduction <add>, %12, %cst [1] : vector<4x256xf32> to vector<4xf32>
    %15 = vector.shape_cast %14 : vector<4xf32> to vector<4x1xf32>
    %16 = arith.addf %13, %15 : vector<4x1xf32>
    %c0_9 = arith.constant 0 : index
    %c0_10 = arith.constant 0 : index
    %17 = vector.load %arg6[%c0_9, %c0_10] : memref<4x1xf32, #tpu.memory_space<vmem>>, vector<4x1xf32>
    tpu.vector_store %arg6[%c0_9, %c0_10], %16 {strides = array<i32>} : memref<4x1xf32, #tpu.memory_space<vmem>>, vector<4x1xf32>,
    %c0_11 = arith.constant 0 : index
    %c0_12 = arith.constant 0 : index
    %18 = vector.load %arg7[%c0_11, %c0_12] : memref<4x1xf32, #tpu.memory_space<vmem>>, vector<4x1xf32>
    %19 = arith.mulf %12, %12 : vector<4x256xf32>
    %cst_13 = arith.constant dense<0.000000e+00> : vector<4xf32>
    %20 = vector.multi_reduction <add>, %19, %cst_13 [1] : vector<4x256xf32> to vector<4xf32>
    %21 = vector.shape_cast %20 : vector<4xf32> to vector<4x1xf32>
    %22 = arith.addf %18, %21 : vector<4x1xf32>
    %c0_14 = arith.constant 0 : index
    %c0_15 = arith.constant 0 : index
    %23 = vector.load %arg7[%c0_14, %c0_15] : memref<4x1xf32, #tpu.memory_space<vmem>>, vector<4x1xf32>
    tpu.vector_store %arg7[%c0_14, %c0_15], %22 {strides = array<i32>} : memref<4x1xf32, #tpu.memory_space<vmem>>, vector<4x1xf32>,
    %24 = arith.extui %5 : i1 to i32
    %c0_i32_16 = arith.constant 0 : i32
    %25 = arith.cmpi ne, %24, %c0_i32_16 : i32
    scf.if %25 {
      %c0_17 = arith.constant 0 : index
      %c0_18 = arith.constant 0 : index
      %26 = vector.load %arg6[%c0_17, %c0_18] : memref<4x1xf32, #tpu.memory_space<vmem>>, vector<4x1xf32>
      %c0_19 = arith.constant 0 : index
      %c0_20 = arith.constant 0 : index
      %27 = vector.load %arg5[%c0_19, %c0_20] : memref<4x1xf32, #tpu.memory_space<vmem>>, vector<4x1xf32>
      %cst_21 = arith.constant 5.120000e+02 : f32
      %28 = vector.broadcast %cst_21 : f32 to vector<4x1xf32>
      %29 = arith.divf %26, %28 : vector<4x1xf32>
      %30 = arith.addf %27, %29 : vector<4x1xf32>
      %c0_22 = arith.constant 0 : index
      %c0_23 = arith.constant 0 : index
      %31 = vector.load %arg7[%c0_22, %c0_23] : memref<4x1xf32, #tpu.memory_space<vmem>>, vector<4x1xf32>
      %32 = arith.mulf %26, %26 : vector<4x1xf32>
      %cst_24 = arith.constant 5.120000e+02 : f32
      %33 = vector.broadcast %cst_24 : f32 to vector<4x1xf32>
      %34 = arith.divf %32, %33 : vector<4x1xf32>
      %35 = arith.subf %31, %34 : vector<4x1xf32>
      %cst_25 = arith.constant 5.120000e+02 : f32
      %cst_26 = arith.constant 1.000000e+00 : f32
      %36 = arith.subf %cst_25, %cst_26 : f32
      %37 = vector.broadcast %36 : f32 to vector<4x1xf32>
      %38 = arith.divf %35, %37 : vector<4x1xf32>
      %cst_27 = arith.constant 0.000000e+00 : f32
      %39 = vector.broadcast %cst_27 : f32 to vector<4x1xf32>
      %40 = arith.maximumf %38, %39 : vector<4x1xf32>
      %41 = math.sqrt %40 : vector<4x1xf32>
      %cst_28 = arith.constant 9.99999971E-10 : f32
      %42 = vector.broadcast %cst_28 : f32 to vector<4x1xf32>
      %43 = arith.addf %41, %42 : vector<4x1xf32>
      %cst_29 = arith.constant 1.000000e+00 : f32
      %44 = vector.broadcast %cst_29 : f32 to vector<4x1xf32>
      %45 = arith.divf %44, %43 : vector<4x1xf32>
      %c0_30 = arith.constant 0 : index
      %c0_31 = arith.constant 0 : index
      %46 = vector.load %arg3[%c0_30, %c0_31] : memref<4x1xf32, #tpu.memory_space<vmem>>, vector<4x1xf32>
      tpu.vector_store %arg3[%c0_30, %c0_31], %45 {strides = array<i32>} : memref<4x1xf32, #tpu.memory_space<vmem>>, vector<4x1xf32>,
      %cst_32 = arith.constant 0.000000e+00 : f32
      %47 = vector.broadcast %cst_32 : f32 to vector<4x1xf32>
      %48 = arith.subf %47, %30 : vector<4x1xf32>
      %c0_33 = arith.constant 0 : index
      %c0_34 = arith.constant 0 : index
      %49 = vector.load %arg4[%c0_33, %c0_34] : memref<4x1xf32, #tpu.memory_space<vmem>>, vector<4x1xf32>
      tpu.vector_store %arg4[%c0_33, %c0_34], %48 {strides = array<i32>} : memref<4x1xf32, #tpu.memory_space<vmem>>, vector<4x1xf32>,
    } else {
    }
    return
  }
  func.func @transform_0(%arg0: i32, %arg1: i32) -> (i32, i32, i32) {
    %c0_i32 = arith.constant 0 : i32
    %c0_i32_0 = arith.constant 0 : i32
    return %arg0, %c0_i32, %arg1 : i32, i32, i32
  }
  func.func @transform_1(%arg0: i32, %arg1: i32) -> (i32, i32) {
    %c0_i32 = arith.constant 0 : i32
    %c0_i32_0 = arith.constant 0 : i32
    %c0_i32_1 = arith.constant 0 : i32
    return %c0_i32, %c0_i32_0 : i32, i32
  }
  func.func @transform_2(%arg0: i32, %arg1: i32) -> (i32, i32) {
    %c0_i32 = arith.constant 0 : i32
    %c0_i32_0 = arith.constant 0 : i32
    %c0_i32_1 = arith.constant 0 : i32
    return %c0_i32, %c0_i32_0 : i32, i32
  }
}

</mosaic_0001>

<bundles_post_ra>
// kernel: actnorm_forward.2
= control target key start
LH: loop header
LB: loop body
LE: loop exit
PB: predicated region body
PF: predicated region fallthrough
CT: control target
= control target key end

     0   :  { %s381_s9 = smov 0   ;;  %s383_s10 = smov 0   ;;  %s429_s0 = inlined_call_operand.vmem [shape: f32[2,4,256], index: 0, kind: input, shape index: {}]   ;;  %s430_s1 = inlined_call_operand.vmem [shape: f32[4,1], index: 1, kind: output, shape index: {0}]   ;;  %s431_s2 = inlined_call_operand.vmem [shape: f32[4,1], index: 2, kind: output, shape index: {1}]  }
   0x1   :  { %s385_s11 = smov 0  }
   0x2 LB: > { %s25_s12 = sadd.s32 1, %s357_s10  ;;  %p297_p0 = scmp.ge.s32.totalorder %s361_s11, 1  ;;  %s361_s11 = sphi %s385_s11, %s13_s11   ;;  %s357_s10 = sphi %s383_s10, %s433_s10   ;;  %s353_s9 = sphi %s381_s9, %s432_s9  }
   0x3   : > { %p27_p1 = scmp.ge.s32.totalorder %s25_s12, 2  ;;  %p124_p2 = scmp.lt.s32.totalorder %s361_s11, 3 }
   0x5   : > { %s435_s12 = smov (%p27_p1, %s25_s12), 0  ;;  %p125_p3 = pnand %p297_p0, %p124_p2 }
   0x6   : > { %p146_p4 = scmp.lt.s32.totalorder (!%p125_p3), %s353_s9, 1  ;;  %p155_p5 = scmp.eq.s32.totalorder (!%p125_p3), %s353_s9, 0 }
   0x7   : > { %128 = sbr.rel (%p125_p3) target bundleno = 496 (0x1f0), region = 24  ;;  %p159_p6 = scmp.eq.s32.totalorder (!%p125_p3), %s353_s9, 1 }
   0xc   : > { %s147_s13 = scalar_select %p146_p4, %s353_s9, 1  ;;  %vm168_vm0 = vcmask (%p155_p5), 1043456   ;;  %vm176_vm1 = vcmask (%p155_p5), 3072   ;;  %v363_v5 = vmov (%p155_p5), 0.0  }
   0xd   : > { %164 = sbr.rel (!%p155_p5) target bundleno = 163 (0xa3), region = 28  ;;  %178 = vst.msk [vmem:[#allocation3] sm:$0xf] (%p155_p5), %vm176_vm1, %v363_v5  ;;  %179 = vst.msk [vmem:[#allocation4] sm:$0xf] (%p155_p5), %vm176_vm1, %v363_v5 }
   0xe   : > { %s304_s14 = sshll.u32 %s147_s13, 3 }
   0xf   : > { %s153_s17 = scalar_lea.vmem %s429_s0, %s304_s14 }
  0x10   : > { %v162_v0 = vld [vmem:[%s153_s17] sm:$0xff] }
  0x11   : > { %v166_v1 = vcombine.high (%p155_p5), %v162_v0, %v162_v0  ;;  %v169_v2 = vsel (%p155_p5), %vm168_vm0, %v162_v0, 0.0 }
  0x13   : > { %v170_v3 = vsel %vm168_vm0, %v166_v1, 0.0 }
  0x14   : > { %v171_v4 = vadd.f32 %v170_v3, %v169_v2 }
  0x16   : > { %172 = vadd.xlane.f32.xlu0 %v171_v4 }
  0x9f   : > { %v173_v6 = vpop.xlane.xlu0 %172 }
  0xa0   : > { %v175_v7 = vmul.f32 0.00390625, %v173_v6 }
  0xa2   : > { %177 = vst.msk [vmem:[#allocation2] sm:$0xf] %vm176_vm1, %v175_v7 }
  0xa3 PF: > { %v364_v9 = vmov 0   ;;  %v365_v10 = vmov 839922192   ;;  %v188_v12 = vlaneseq  ;;  %vm198_vm2 = vcmask 1043456  }
  0xa4   : > { %334 = vset.pattern.permute.xlu0 %v364_v9  ;;  %v186_v11 = vunpack.c.l.s4 %v365_v10  ;;  %vm205_vm3 = vcmask 3072  }
  0xa5   : > { %v189_v14 = vshrl.u32 %v188_v12, 7  ;;  %v194_v28 = vld [vmem:[#allocation3] sm:$0xf]  ;;  %v207_v30 = vld [vmem:[#allocation4] sm:$0xf] }
  0xa6   : > { %v187_v13 = vunpack.c.0.s8 %v186_v11 }
  0xa8   : > { %v190_v15 = vsub.s32 %v187_v13, %v189_v14 }
  0xa9   : > { %v180_v8 = vld [vmem:[#allocation2] sm:$0xf] }
  0xaa   : > { %183 = vperm.xlu0 %334, %v180_v8   ;;  %v222_v35 = vld [vmem:[#allocation2] sm:$0xf] (%p159_p6) }
 0x125   : > { %v184_v16 = vpop.permute.xlu0 %183 }
 0x126   : > { %v191_v17 = vrot.slane %v184_v16, %v190_v15 }
 0x128   : > { %v193_v18 = vsub.f32 %v162_v0, %v191_v17 }
 0x12a   : > { %v196_v19 = vcombine.high %v193_v18, %v193_v18  ;;  %v208_v20 = vmul.f32 %v193_v18, %v193_v18  ;;  %v199_v21 = vsel %vm198_vm2, %v193_v18, 0.0 }
 0x12c   : > { %v200_v22 = vsel %vm198_vm2, %v196_v19, 0.0  ;;  %v210_v23 = vcombine.high %v208_v20, %v208_v20  ;;  %v212_v25 = vsel %vm198_vm2, %v208_v20, 0.0 }
 0x12d   : > { %v201_v24 = vadd.f32 %v200_v22, %v199_v21 }
 0x12e   : > { %v213_v26 = vsel %vm198_vm2, %v210_v23, 0.0 }
 0x12f   : > { %202 = vadd.xlane.f32.xlu0 %v201_v24  ;;  %v214_v27 = vadd.f32 %v213_v26, %v212_v25 }
 0x131   : > { %215 = vadd.xlane.f32.xlu1 %v214_v27 }
 0x1b8   : > { %v203_v29 = vpop.xlane.xlu0 %202 }
 0x1b9   : > { %v204_v31 = vadd.f32 %v203_v29, %v194_v28  ;;  %220 = sbr.rel (!%p159_p6) target bundleno = 496 (0x1f0), region = 32 }
 0x1ba   : > { %v216_v32 = vpop.xlane.xlu1 %215 }
 0x1bb   : > { %206 = vst.msk [vmem:[#allocation3] sm:$0xf] %vm205_vm3, %v204_v31  ;;  %v217_v33 = vadd.f32 %v216_v32, %v207_v30 }
 0x1bd   : > { %218 = vst.msk [vmem:[#allocation4] sm:$0xf] %vm205_vm3, %v217_v33 }
 0x1c2   : > { %v221_v34 = vld [vmem:[#allocation3] sm:$0xf] }
 0x1c3   : > { %v227_v36 = vmul.f32 %v221_v34, %v221_v34  ;;  %v224_v37 = vmul.f32 0.001953125, %v221_v34 }
 0x1c4   : > { %v226_v38 = vld [vmem:[#allocation4] sm:$0xf] }
 0x1c5   : > { %v228_v39 = vmul.f32 0.001953125, %v227_v36  ;;  %v225_v40 = vadd.f32 %v224_v37, %v222_v35 }
 0x1c7   : > { %v229_v41 = vsub.f32 %v226_v38, %v228_v39  ;;  %v244_v42 = vsub.f32 0.0, %v225_v40 }
 0x1c9   : > { %v231_v43 = vmul.f32 0.0019569471, %v229_v41  ;;  %245 = vst.msk [vmem:[%s431_s2] sm:$0xf] %vm205_vm3, %v244_v42 }
 0x1cb   : > { %v232_v44 = vmax.f32 %v231_v43, 0.0 }
 0x1cd   : > { %335 = vrsqrt.f32 %v232_v44  ;;  %vm235_vm4 = vcmp.eq.f32.partialorder %v232_v44, inf  ;;  %v238_v46 = vand.u32 2147483648, %v232_v44  ;;  %vm237_vm5 = vcmp.eq.f32.partialorder %v232_v44, 0.0 }
 0x1da   : > { %v336_v45 = vpop.eup %335 }
 0x1db   : > { %v234_v47 = vmul.f32 %v336_v45, %v232_v44 }
 0x1dd   : > { %v236_v48 = vsel %vm235_vm4, %v232_v44, %v234_v47 }
 0x1de   : > { %v239_v49 = vsel %vm237_vm5, %v238_v46, %v236_v48 }
 0x1df   : > { %v240_v50 = vadd.f32 1e-09, %v239_v49 }
 0x1e1   : > { %337 = vrcp.f32 %v240_v50 }
 0x1ee   : > { %v338_v51 = vpop.eup %337 }
 0x1ef   : > { %243 = vst.msk [vmem:[%s430_s1] sm:$0xf] %vm205_vm3, %v338_v51 }
 0x1f0 PF: > { %s13_s11 = sadd.s32 1, %s361_s11   ;;  %s432_s9 = smov %s357_s10 }
 0x1f1   : > { %p10_p7 = scmp.ge.s32.totalorder %s13_s11, 4   ;;  %s433_s10 = smov %s435_s12 }
 0x1f3   :  { %12 = sbr.rel (!%p10_p7) target bundleno = 2 (0x2), region = 66 }

// kernel: actnorm_forward.3
= control target key start
LH: loop header
LB: loop body
LE: loop exit
PB: predicated region body
PF: predicated region fallthrough
CT: control target
= control target key end

     0   :  { %s413_s12 = smov 0   ;;  %s415_s13 = smov 0   ;;  %s452_s0 = inlined_call_operand.vmem [shape: f32[4,1], index: 0, kind: input, shape index: {}]   ;;  %s453_s1 = inlined_call_operand.vmem [shape: f32[4,1], index: 1, kind: input, shape index: {}]   ;;  %s454_s2 = inlined_call_operand.vmem [shape: f32[2,4,256], index: 2, kind: input, shape index: {}]   ;;  %s455_s3 = inlined_call_operand.vmem [shape: f32[2,4,256], index: 3, kind: output, shape index: {}]  }
   0x1   :  { %s417_s14 = smov 0  }
   0x2 LB: > { %s25_s15 = sadd.s32 1, %s385_s13  ;;  %p331_p0 = scmp.ge.s32.totalorder %s389_s14, 1  ;;  %s389_s14 = sphi %s417_s14, %s13_s14   ;;  %s385_s13 = sphi %s415_s13, %s457_s13   ;;  %s381_s12 = sphi %s413_s12, %s456_s12  }
   0x3   : > { %p27_p1 = scmp.ge.s32.totalorder %s25_s15, 2  ;;  %p158_p2 = scmp.lt.s32.totalorder %s389_s14, 3 }
   0x5   : > { %s459_s15 = smov (%p27_p1, %s25_s15), 0  ;;  %p159_p3 = pnand %p331_p0, %p158_p2 }
   0x6   : > { %p191_p4 = scmp.lt.s32.totalorder (!%p159_p3), %s381_s12, 1 }
   0x7   : > { %162 = sbr.rel (%p159_p3) target bundleno = 147 (0x93), region = 32 }
   0xc   : > { %v211_v0 = vld [vmem:[%s453_s1] sm:$0xf]  ;;  %v391_v1 = vmov 0   ;;  %v392_v3 = vmov 839922192   ;;  %v219_v5 = vlaneseq  ;;  %s461_s12 = smov (!%p191_p4, %s381_s12), 1 }
   0xd   : > { %366 = vset.pattern.permute.xlu0 %v391_v1  ;;  %v225_v2 = vld [vmem:[%s452_s0] sm:$0xf]  ;;  %v217_v4 = vunpack.c.l.s4 %v392_v3  ;;  %s338_s20 = sshll.u32 %s461_s12, 3 }
   0xe   : > { %214 = vperm.xlu0 %366, %v211_v0   ;;  %v220_v7 = vshrl.u32 %v219_v5, 7  ;;  %s198_s23 = scalar_lea.vmem %s454_s2, %s338_s20  ;;  %s208_s26 = scalar_lea.vmem %s455_s3, %s338_s20 }
   0xf   : > { %v218_v6 = vunpack.c.0.s8 %v217_v4  ;;  %v210_v11 = vld [vmem:[%s198_s23] sm:$0xff] }
  0x11   : > { %v221_v8 = vsub.s32 %v218_v6, %v220_v7 }
  0x12   : > { %228 = vperm.xlu0 %366, %v225_v2  }
  0x89   : > { %v215_v9 = vpop.permute.xlu0 %214 }
  0x8a   : > { %v222_v10 = vrot.slane %v215_v9, %v221_v8 }
  0x8c   : > { %v224_v13 = vadd.f32 %v222_v10, %v210_v11 }
  0x8d   : > { %v229_v12 = vpop.permute.xlu0 %228 }
  0x8e   : > { %v236_v14 = vrot.slane %v229_v12, %v221_v8 }
  0x90   : > { %v238_v15 = vmul.f32 %v236_v14, %v224_v13 }
  0x92   : > { %239 = vst [vmem:[%s208_s26] sm:$0xff] %v238_v15 }
  0x93 PF: > { %s13_s14 = sadd.s32 1, %s389_s14   ;;  %s456_s12 = smov %s385_s13 }
  0x94   : > { %p10_p5 = scmp.ge.s32.totalorder %s13_s14, 4   ;;  %s457_s13 = smov %s459_s15 }
  0x96   :  { %12 = sbr.rel (!%p10_p5) target bundleno = 2 (0x2), region = 62 }

</bundles_post_ra>
